<compile_context>
chip_gen: v7x
topology: tpu7x:2x2x1
jax: 0.10.0
libtpu: 0.0.40
codegen_flags: <defaults>
</compile_context>

<pallas_src>
import jax
import jax.numpy as jnp
import numpy as np
from jax import lax
from jax.experimental import pallas as pl
from jax.experimental.pallas import tpu as pltpu

NUM_NODES = 64
EMBED_DIM = 32
NUM_LAYERS = 2
NUM_EDGES = 16


def make_fused_gcn_kernel(num_layers: int):
    """Fused LightGCN forward: adjacency build + propagation + gather + scoring."""

    def kernel(ei_ref, eli_t_ref, x_ref, w_ref, score_ref):
        # ei_ref:    (2, E_adj) int32 VMEM   row 0 = source j, row 1 = target i
        # eli_t_ref: (E_lab, 2) int32 VMEM   col 0 = src, col 1 = dst (edge_label_index^T)
        # x_ref:     (N, D)     f32   VMEM   embedding.weight
        # w_ref:     (L+1,)     f32   SMEM   softmax(alpha)
        # score_ref: (1, E_lab) f32   VMEM   lane-dense link scores
        n = x_ref.shape[0]
        d = x_ref.shape[1]
        e_adj = ei_ref.shape[1]
        e_lab = eli_t_ref.shape[0]

        # --- dense normalized adjacency built in-kernel (gcn_norm, no self loops) ---
        ei = ei_ref[...]                                            # (2, E_adj)
        node_sub = lax.broadcasted_iota(jnp.int32, (n, e_adj), 0)   # node id on sublanes
        src_oh = (node_sub == ei[0:1, :]).astype(jnp.float32)       # (N, E): 1[src_e == n]
        dst_oh = (node_sub == ei[1:2, :]).astype(jnp.float32)       # (N, E): 1[dst_e == n]
        # A[i, j] = #edges (j -> i)  ==  dst_oh @ src_oh^T   (contract edge axis)
        adj = lax.dot_general(
            dst_oh, src_oh, (((1,), (1,)), ((), ())),
            preferred_element_type=jnp.float32)                     # (N, N)
        deg = jnp.sum(adj, axis=1, keepdims=True)                   # (N, 1) in-degree
        d_inv_sqrt = jnp.where(
            deg > 0.0, lax.rsqrt(jnp.maximum(deg, 1e-12)), 0.0)     # (N, 1)

        # --- LightGCN propagation: out = sum_l w_l * (A_norm^l @ X) ---
        # A_norm @ x  ==  d^{-1/2} * (A @ (d^{-1/2} * x))
        x = x_ref[...]
        out = x * w_ref[0]
        for l in range(num_layers):                                 # static unroll
            x = d_inv_sqrt * jnp.dot(
                adj, d_inv_sqrt * x, preferred_element_type=jnp.float32)
            out = out + x * w_ref[l + 1]

        # --- edge gather (one-hot matmul) + dot-product link scores (lane-dense) ---
        eli_t = eli_t_ref[...]                                      # (E_lab, 2)
        node_lane = lax.broadcasted_iota(jnp.int32, (e_lab, n), 1)  # node id on lanes
        gsrc_oh = (node_lane == eli_t[:, 0:1]).astype(jnp.float32)  # (E, N)
        gdst_oh = (node_lane == eli_t[:, 1:2]).astype(jnp.float32)  # (E, N)
        src_emb = jnp.dot(gsrc_oh, out, preferred_element_type=jnp.float32)  # (E, D)
        dst_emb = jnp.dot(gdst_oh, out, preferred_element_type=jnp.float32)  # (E, D)
        prod = src_emb * dst_emb                                    # (E, D)
        ones_row = jnp.ones((1, d), jnp.float32)
        # scores[0, e] = sum_d prod[e, d]  -> (1, E), E on the lane axis (unstrided store)
        score_ref[...] = lax.dot_general(
            ones_row, prod, (((1,), (1,)), ((), ())),
            preferred_element_type=jnp.float32)

    return kernel


def gcn_forward(edge_index, embedding_weight, alpha, num_layers,
                edge_label_index=None):
    """Equivalent of GCN.forward(edge_index) with conv_layer='LGC'."""
    if edge_label_index is None:
        edge_label_index = edge_index

    N, D = embedding_weight.shape
    E = edge_label_index.shape[1]

    w = jax.nn.softmax(alpha.astype(jnp.float32))   # self.alpha.softmax(dim=-1)
    ei = edge_index.astype(jnp.int32)               # (2, E_adj): row layout for (1,E) slices
    eli_t = edge_label_index.astype(jnp.int32).T    # (E, 2): column layout for (E,1) slices

    scores = pl.pallas_call(
        make_fused_gcn_kernel(num_layers),
        out_shape=jax.ShapeDtypeStruct((1, E), jnp.float32),
        in_specs=[
            pl.BlockSpec(memory_space=pltpu.MemorySpace.VMEM),   # edge_index
            pl.BlockSpec(memory_space=pltpu.MemorySpace.VMEM),   # edge_label_index^T
            pl.BlockSpec(memory_space=pltpu.MemorySpace.VMEM),   # embedding.weight
            pl.BlockSpec(memory_space=pltpu.MemorySpace.SMEM),   # softmax(alpha) weights
        ],
        out_specs=pl.BlockSpec(memory_space=pltpu.MemorySpace.VMEM),
    )(ei, eli_t, embedding_weight.astype(jnp.float32), w)

    return scores[0]


def _reference_forward(edge_index, embedding_weight, alpha, num_layers):
    """Pure-JAX reference for validation."""
    N, D = embedding_weight.shape
    row, col = edge_index[0], edge_index[1]
    A = jnp.zeros((N, N), jnp.float32).at[col, row].add(1.0)
    deg = jnp.sum(A, axis=1)
    d_inv_sqrt = jnp.where(deg > 0.0, 1.0 / jnp.sqrt(jnp.maximum(deg, 1e-12)), 0.0)
    a_norm = d_inv_sqrt[:, None] * A * d_inv_sqrt[None, :]
    w = jax.nn.softmax(alpha)
    x = embedding_weight
    out = w[0] * x
    for l in range(num_layers):
        x = a_norm @ x
        out = out + w[l + 1] * x
    src = out[edge_index[0]]
    dst = out[edge_index[1]]
    return jnp.sum(src * dst, axis=-1)


if __name__ == "__main__":
    key = jax.random.PRNGKey(0)
    k_emb, k_edge = jax.random.split(key)

    # Embedding.weight with xavier_uniform_ init (deterministic, in-script).
    limit = float(np.sqrt(6.0 / (NUM_NODES + EMBED_DIM)))
    emb = jax.random.uniform(
        k_emb, (NUM_NODES, EMBED_DIM), jnp.float32, -limit, limit
    )

    # Buffer alpha: default (alpha=None, not learnable) -> 1/(num_layers+1) each.
    alpha = jnp.full((NUM_LAYERS + 1,), 1.0 / (NUM_LAYERS + 1), jnp.float32)

    # edge_index (2, E); edge_label_index defaults to edge_index in forward().
    edge_index = jax.random.randint(
        k_edge, (2, NUM_EDGES), 0, NUM_NODES, dtype=jnp.int32
    )

    fwd = jax.jit(gcn_forward, static_argnums=(3,))
    scores = jax.block_until_ready(fwd(edge_index, emb, alpha, NUM_LAYERS))

    ref = _reference_forward(edge_index, emb, alpha, NUM_LAYERS)
    assert scores.shape == (NUM_EDGES,)
    assert np.allclose(np.asarray(scores), np.asarray(ref), rtol=1e-5, atol=1e-5), (
        "Pallas result mismatch vs reference"
    )
    print("KERNEL_OK")
</pallas_src>

<mosaic_0001>
module attributes {stable_mosaic.version = 11 : i64} {
  func.func @kernel(%arg0: memref<2x16xi32, #tpu.memory_space<vmem>>, %arg1: memref<16x2xi32, #tpu.memory_space<vmem>>, %arg2: memref<64x32xf32, #tpu.memory_space<vmem>>, %arg3: memref<3xf32, #tpu.memory_space<smem>>, %arg4: memref<1x16xf32, #tpu.memory_space<vmem>>) attributes {dimension_semantics = [], scalar_prefetch = 0 : i64, scratch_operands = 0 : i64, tpu.core_type = #tpu.core_type<tc>} {
    %c0 = arith.constant 0 : index
    %c0_0 = arith.constant 0 : index
    %0 = vector.load %arg0[%c0, %c0_0] : memref<2x16xi32, #tpu.memory_space<vmem>>, vector<2x16xi32>
    %1 = tpu.iota {dimensions = array<i32: 0>} : vector<64x16xi32>
    %2 = vector.extract_strided_slice %0 {offsets = [0, 0], sizes = [1, 16], strides = [1, 1]} : vector<2x16xi32> to vector<1x16xi32>
    %3 = vector.broadcast %2 : vector<1x16xi32> to vector<64x16xi32>
    %4 = arith.cmpi eq, %1, %3 : vector<64x16xi32>
    %5 = arith.extui %4 : vector<64x16xi1> to vector<64x16xi32>
    %6 = arith.sitofp %5 : vector<64x16xi32> to vector<64x16xf32>
    %7 = vector.extract_strided_slice %0 {offsets = [1, 0], sizes = [1, 16], strides = [1, 1]} : vector<2x16xi32> to vector<1x16xi32>
    %8 = vector.broadcast %7 : vector<1x16xi32> to vector<64x16xi32>
    %9 = arith.cmpi eq, %1, %8 : vector<64x16xi32>
    %10 = arith.extui %9 : vector<64x16xi1> to vector<64x16xi32>
    %11 = arith.sitofp %10 : vector<64x16xi32> to vector<64x16xf32>
    %cst = arith.constant dense<0.000000e+00> : vector<64x64xf32>
    %12 = tpu.matmul %11, %6, %cst {dimension_numbers = #tpu.dot_dimension_numbers<[1], [1], [0], [0], [0, 0, 1, 0], [], []>} : vector<64x16xf32>, vector<64x16xf32>, vector<64x64xf32> -> vector<64x64xf32>
    %cst_1 = arith.constant dense<0.000000e+00> : vector<64xf32>
    %13 = vector.multi_reduction <add>, %12, %cst_1 [1] : vector<64x64xf32> to vector<64xf32>
    %14 = vector.shape_cast %13 : vector<64xf32> to vector<64x1xf32>
    %cst_2 = arith.constant 0.000000e+00 : f32
    %15 = vector.broadcast %cst_2 : f32 to vector<64x1xf32>
    %16 = arith.cmpf ogt, %14, %15 : vector<64x1xf32>
    %cst_3 = arith.constant 9.99999996E-13 : f32
    %17 = vector.broadcast %cst_3 : f32 to vector<64x1xf32>
    %18 = arith.maximumf %14, %17 : vector<64x1xf32>
    %19 = math.rsqrt %18 : vector<64x1xf32>
    %cst_4 = arith.constant 0.000000e+00 : f32
    %20 = vector.broadcast %cst_4 : f32 to vector<64x1xf32>
    %21 = arith.select %16, %19, %20 : vector<64x1xi1>, vector<64x1xf32>
    %c0_5 = arith.constant 0 : index
    %c0_6 = arith.constant 0 : index
    %22 = vector.load %arg2[%c0_5, %c0_6] : memref<64x32xf32, #tpu.memory_space<vmem>>, vector<64x32xf32>
    %c0_7 = arith.constant 0 : index
    %23 = memref.load %arg3[%c0_7] : memref<3xf32, #tpu.memory_space<smem>>
    %24 = vector.broadcast %23 : f32 to vector<64x32xf32>
    %25 = arith.mulf %22, %24 : vector<64x32xf32>
    %26 = vector.broadcast %21 : vector<64x1xf32> to vector<64x32xf32>
    %27 = arith.mulf %26, %22 : vector<64x32xf32>
    %cst_8 = arith.constant dense<0.000000e+00> : vector<64x32xf32>
    %28 = tpu.matmul %12, %27, %cst_8 {dimension_numbers = #tpu.dot_dimension_numbers<[1], [0], [0], [1], [0, 0, 1, 1], [], []>} : vector<64x64xf32>, vector<64x32xf32>, vector<64x32xf32> -> vector<64x32xf32>
    %29 = vector.broadcast %21 : vector<64x1xf32> to vector<64x32xf32>
    %30 = arith.mulf %29, %28 : vector<64x32xf32>
    %c1 = arith.constant 1 : index
    %31 = memref.load %arg3[%c1] : memref<3xf32, #tpu.memory_space<smem>>
    %32 = vector.broadcast %31 : f32 to vector<64x32xf32>
    %33 = arith.mulf %30, %32 : vector<64x32xf32>
    %34 = arith.addf %25, %33 : vector<64x32xf32>
    %35 = vector.broadcast %21 : vector<64x1xf32> to vector<64x32xf32>
    %36 = arith.mulf %35, %30 : vector<64x32xf32>
    %cst_9 = arith.constant dense<0.000000e+00> : vector<64x32xf32>
    %37 = tpu.matmul %12, %36, %cst_9 {dimension_numbers = #tpu.dot_dimension_numbers<[1], [0], [0], [1], [0, 0, 1, 1], [], []>} : vector<64x64xf32>, vector<64x32xf32>, vector<64x32xf32> -> vector<64x32xf32>
    %38 = vector.broadcast %21 : vector<64x1xf32> to vector<64x32xf32>
    %39 = arith.mulf %38, %37 : vector<64x32xf32>
    %c2 = arith.constant 2 : index
    %40 = memref.load %arg3[%c2] : memref<3xf32, #tpu.memory_space<smem>>
    %41 = vector.broadcast %40 : f32 to vector<64x32xf32>
    %42 = arith.mulf %39, %41 : vector<64x32xf32>
    %43 = arith.addf %34, %42 : vector<64x32xf32>
    %c0_10 = arith.constant 0 : index
    %c0_11 = arith.constant 0 : index
    %44 = vector.load %arg1[%c0_10, %c0_11] : memref<16x2xi32, #tpu.memory_space<vmem>>, vector<16x2xi32>
    %45 = tpu.iota {dimensions = array<i32: 1>} : vector<16x64xi32>
    %46 = vector.extract_strided_slice %44 {offsets = [0, 0], sizes = [16, 1], strides = [1, 1]} : vector<16x2xi32> to vector<16x1xi32>
    %47 = vector.broadcast %46 : vector<16x1xi32> to vector<16x64xi32>
    %48 = arith.cmpi eq, %45, %47 : vector<16x64xi32>
    %49 = arith.extui %48 : vector<16x64xi1> to vector<16x64xi32>
    %50 = arith.sitofp %49 : vector<16x64xi32> to vector<16x64xf32>
    %51 = vector.extract_strided_slice %44 {offsets = [0, 1], sizes = [16, 1], strides = [1, 1]} : vector<16x2xi32> to vector<16x1xi32>
    %52 = vector.broadcast %51 : vector<16x1xi32> to vector<16x64xi32>
    %53 = arith.cmpi eq, %45, %52 : vector<16x64xi32>
    %54 = arith.extui %53 : vector<16x64xi1> to vector<16x64xi32>
    %55 = arith.sitofp %54 : vector<16x64xi32> to vector<16x64xf32>
    %cst_12 = arith.constant dense<0.000000e+00> : vector<16x32xf32>
    %56 = tpu.matmul %50, %43, %cst_12 {dimension_numbers = #tpu.dot_dimension_numbers<[1], [0], [0], [1], [0, 0, 1, 1], [], []>} : vector<16x64xf32>, vector<64x32xf32>, vector<16x32xf32> -> vector<16x32xf32>
    %cst_13 = arith.constant dense<0.000000e+00> : vector<16x32xf32>
    %57 = tpu.matmul %55, %43, %cst_13 {dimension_numbers = #tpu.dot_dimension_numbers<[1], [0], [0], [1], [0, 0, 1, 1], [], []>} : vector<16x64xf32>, vector<64x32xf32>, vector<16x32xf32> -> vector<16x32xf32>
    %58 = arith.mulf %56, %57 : vector<16x32xf32>
    %cst_14 = arith.constant 1.000000e+00 : f32
    %59 = vector.broadcast %cst_14 : f32 to vector<1x32xf32>
    %cst_15 = arith.constant dense<0.000000e+00> : vector<1x16xf32>
    %60 = tpu.matmul %59, %58, %cst_15 {dimension_numbers = #tpu.dot_dimension_numbers<[1], [1], [0], [0], [0, 0, 1, 0], [], []>} : vector<1x32xf32>, vector<16x32xf32>, vector<1x16xf32> -> vector<1x16xf32>
    %c0_16 = arith.constant 0 : index
    %c0_17 = arith.constant 0 : index
    %61 = vector.load %arg4[%c0_16, %c0_17] : memref<1x16xf32, #tpu.memory_space<vmem>>, vector<1x16xf32>
    tpu.vector_store %arg4[%c0_16, %c0_17], %60 {strides = array<i32>} : memref<1x16xf32, #tpu.memory_space<vmem>>, vector<1x16xf32>,
    return
  }
}

</mosaic_0001>

<bundles_post_ra>
// kernel: gcn_forward.1
= control target key start
LH: loop header
LB: loop body
LE: loop exit
PB: predicated region body
PF: predicated region fallthrough
CT: control target
= control target key end

     0   :  { %9 = vsyncpa [#allocation4], 0  ;;  %s1645_s0 = inlined_call_operand.vmem [shape: s32[2,16], index: 0, kind: input, shape index: {}]   ;;  %s1646_s1 = inlined_call_operand.vmem [shape: s32[16,2], index: 1, kind: input, shape index: {}]   ;;  %s1647_s2 = inlined_call_operand.vmem [shape: f32[64,32], index: 2, kind: input, shape index: {}]   ;;  %s1648_s3 = inlined_call_operand.vmem [shape: f32[3], index: 3, kind: input, shape index: {}]   ;;  %s1649_s4 = inlined_call_operand.hbm [shape: f32[1,16], index: 4, kind: output, shape index: {}]  }
   0x1   :  { %10 = vsyncpa [#allocation3], 0  ;;  %s23_s17 = sshll.u32 %s1648_s3, 4  ;;  %s24_s17 = int_to_ptr.vmem [resolvable:$true] %s23_s17 }
   0x2   :  { %s1299_s18 = scalar_lea.vmem %s24_s17, 16  ;;  %p1304_p1 = scmp.lt.s32.totalorder %s24_s17, %s24_s17 }
   0x3   :  { %p1300_p0 = scmp.ne.s32.totalorder %s24_s17, %s1299_s18  ;;  %p1305_p2 = scmp.lt.s32.totalorder %s1299_s18, %s1299_s18 }
   0x5   :  { %p1306_p3 = por %p1305_p2, %p1304_p1 }
   0x7   :  { %p1307_p4 = pnand %p1306_p3, %p1300_p0 }
   0x9   :  { %1310 = shalt.err (!%p1307_p4)
}
   0xa   :  { %s1337_s19 = smov [#allocation2]  }
   0xb   :  { %26 = dma.vmem_to_smem %s24_s17, 16, %s1337_s19, [#allocation4]  }
   0xc   :  { %1333 = dma.done.wait [#allocation4], 16  }
   0xd   :  { %1334 = vsyncadd [#allocation4], 4294967280 }
   0xe   :  { %30 = sfence }
   0xf   :  { %v32_v0 = vlaneseq  ;;  %v31_v2 = vld [vmem:[%s1645_s0] sm:$0x3]  ;;  %vm97_vm0 = vcmask 130048   ;;  %v1338_v11 = vmov 0.0   ;;  %s957_s13 = sld [smem:[#allocation2 + $0x1]]  ;;  %s966_s14 = sld [smem:[#allocation2 + $0x2]] }
  0x10   :  { %vm1381_vm5 = vmpackc.low %vm97_vm0, %vm97_vm0  ;;  %s1344_s15 = smov [#allocation5]  }
  0x11   :  { %v33_v1 = vshrl.u32 %v32_v0, 7  ;;  %s908_s16 = sshll.u32 %s1344_s15, 4  ;;  %s909_s16 = int_to_ptr.vmem [resolvable:$true] %s908_s16 }
  0x12   :  { %s1311_s17 = scalar_lea.vmem %s909_s16, 16  ;;  %s1315_s18 = scalar_lea.vmem %s909_s16, 32 }
  0x13   :  { %v34_v3 = vadd.s32 8, %v33_v1  ;;  %v43_v4 = vsub.s32 0, %v33_v1  ;;  %v35_v5 = vadd.s32 16, %v33_v1  ;;  %v36_v6 = vadd.s32 24, %v33_v1  ;;  %p1312_p5 = scmp.ne.s32.totalorder %s909_s16, %s1311_s17  ;;  %p1316_p6 = scmp.lt.s32.totalorder %s909_s16, %s909_s16 }
  0x14   :  { %v37_v8 = vadd.s32 32, %v33_v1  ;;  %v38_v9 = vadd.s32 40, %v33_v1  ;;  %v71_v10 = vsub.s32 1, %v33_v1  ;;  %v39_v23 = vadd.s32 48, %v33_v1  ;;  %p1317_p7 = scmp.lt.s32.totalorder %s1315_s18, %s1311_s17 }
  0x15   :  { %v44_v7 = vrot.slane %v31_v2, %v43_v4  ;;  %v40_v24 = vadd.s32 56, %v33_v1 }
  0x16   :  { %v72_v19 = vrot.slane %v31_v2, %v71_v10  ;;  %p1318_p8 = por %p1317_p7, %p1316_p6 }
  0x17   :  { %vm45_vm1 = vcmp.eq.s32.totalorder %v33_v1, %v44_v7  ;;  %vm46_vm2 = vcmp.eq.s32.totalorder %v34_v3, %v44_v7  ;;  %vm47_vm3 = vcmp.eq.s32.totalorder %v35_v5, %v44_v7  ;;  %vm48_vm4 = vcmp.eq.s32.totalorder %v36_v6, %v44_v7 }
  0x18   :  { %v917_v12 = vsel %vm45_vm1, 1.0, %v1338_v11  ;;  %v918_v13 = vsel %vm46_vm2, 1.0, %v1338_v11  ;;  %v919_v15 = vsel %vm47_vm3, 1.0, %v1338_v11  ;;  %v920_v16 = vsel %vm48_vm4, 1.0, %v1338_v11  ;;  %p1319_p9 = pnand %p1318_p8, %p1312_p5 }
  0x19   :  { %v1178_v17 = vpack.c.bf16 %v918_v13, %v917_v12  ;;  %v1184_v18 = vpack.c.bf16 %v920_v16, %v919_v15  ;;  %vm49_vm6 = vcmp.eq.s32.totalorder %v37_v8, %v44_v7  ;;  %vm50_vm7 = vcmp.eq.s32.totalorder %v38_v9, %v44_v7  ;;  %v1480_v16 = vld [vmem:[%s1647_s2 + $0x10] sm:$0xff] }
  0x1a   :  { %vm73_vm8 = vcmp.eq.s32.totalorder %v33_v1, %v72_v19  ;;  %v921_v20 = vsel %vm49_vm6, 1.0, %v1338_v11  ;;  %v922_v21 = vsel %vm50_vm7, 1.0, %v1338_v11  ;;  %vm51_vm9 = vcmp.eq.s32.totalorder %v39_v23, %v44_v7 }
  0x1b   :  { %1180 = vmatprep.subr.msk.bf16.mxu0 %vm1381_vm5, %v1178_v17  ;;  %v925_v22 = vsel %vm73_vm8, 1.0, %v1338_v11  ;;  %v1190_v25 = vpack.c.bf16 %v922_v21, %v921_v20  ;;  %vm52_vm10 = vcmp.eq.s32.totalorder %v40_v24, %v44_v7  ;;  %v923_v26 = vsel %vm51_vm9, 1.0, %v1338_v11 }
  0x1c   :  { %1183 = vmatpush3.bf16.xpose.msk.msra.mxu0 %vm1381_vm5, %v1178_v17  ;;  %1065 = vmatprep.mubr.msk.f32.mxu0 %vm97_vm0, %v925_v22  ;;  %v924_v27 = vsel %vm52_vm10, 1.0, %v1338_v11  ;;  %vm74_vm11 = vcmp.eq.s32.totalorder %v34_v3, %v72_v19  ;;  %vm75_vm12 = vcmp.eq.s32.totalorder %v35_v5, %v72_v19  ;;  %vm76_vm13 = vcmp.eq.s32.totalorder %v36_v6, %v72_v19  ;;  %v1485_v17 = vld [vmem:[%s1647_s2 + $0x18] sm:$0xff] }
  0x1d   :  { %1186 = vmatprep.subr.msk.bf16.mxu0 %vm1381_vm5, %v1184_v18  ;;  %v1196_v28 = vpack.c.bf16 %v924_v27, %v923_v26  ;;  %v926_v29 = vsel %vm74_vm11, 1.0, %v1338_v11  ;;  %v927_v30 = vsel %vm75_vm12, 1.0, %v1338_v11  ;;  %vm77_vm14 = vcmp.eq.s32.totalorder %v37_v8, %v72_v19  ;;  %v1462_v8 = vld [vmem:[%s1647_s2] sm:$0xff]  ;;  %v1503_v26 = vld [vmem:[%s1647_s2 + $0x28] sm:$0xff] }
  0x1e   :  { %v928_v31 = vsel %vm76_vm13, 1.0, %v1338_v11  ;;  %v929_v32 = vsel %vm77_vm14, 1.0, %v1338_v11  ;;  %vm78_vm15 = vcmp.eq.s32.totalorder %v38_v9, %v72_v19  ;;  %vm79_vm1 = vcmp.eq.s32.totalorder %v39_v23, %v72_v19  ;;  %v1467_v9 = vld [vmem:[%s1647_s2 + $0x8] sm:$0xff] }
  0x1f   :  { %v930_v33 = vsel %vm78_vm15, 1.0, %v1338_v11  ;;  %v931_v34 = vsel %vm79_vm1, 1.0, %v1338_v11  ;;  %vm80_vm2 = vcmp.eq.s32.totalorder %v40_v24, %v72_v19  ;;  %vm251_vm3 = vcmask 523264  }
  0x20   :  { %v932_v35 = vsel %vm80_vm2, 1.0, %v1338_v11  ;;  %vm1342_vm15 = vmmov 0   ;;  %vm820_vm1 = vcmask 261120  }
  0x21   :  { %vm1268_vm2 = vmpackc.low %vm820_vm1, %vm820_vm1 }
  0x24   :  { %1189 = vmatpush3.bf16.xpose.msk.msra.mxu0 %vm1381_vm5, %v1184_v18 }
  0x25   :  { %1192 = vmatprep.subr.msk.bf16.mxu0 %vm1381_vm5, %v1190_v25 }
  0x2c   :  { %1195 = vmatpush3.bf16.xpose.msk.msra.mxu0 %vm1381_vm5, %v1190_v25  ;;  %v1498_v25 = vld [vmem:[%s1647_s2 + $0x20] sm:$0xff] }
  0x2d   :  { %1198 = vmatprep.subr.msk.bf16.mxu0 %vm1381_vm5, %v1196_v28 }
  0x34   :  { %1201 = vmatpush3.bf16.xpose.msk.msra.mxu0 %vm1381_vm5, %v1196_v28 }
  0x3b   :  { %1066 = vmatmul.mubr.msk.f32.vlgmr.msra.gmra.mrb[0].mxu0 %vm97_vm0, %v926_v29 }
  0x3c   :  { %1068 = vmatprep.mubr.msk.f32.mxu0 %vm97_vm0, %v927_v30 }
  0x3f   :  { %1069 = vmatmul.mubr.msk.f32.gmra.mrb[2].mxu0 %vm97_vm0, %v928_v31 }
  0x40   :  { %1071 = vmatprep.mubr.msk.f32.mxu0 %vm97_vm0, %v929_v32 }
  0x43   :  { %1072 = vmatmul.mubr.msk.f32.gmra.mrb[4].mxu0 %vm97_vm0, %v930_v33 }
  0x44   :  { %1074 = vmatprep.mubr.msk.f32.mxu0 %vm97_vm0, %v931_v34  ;;  %v1516_v34 = vld [vmem:[%s1647_s2 + $0x30] sm:$0xff] }
  0x47   :  { %1075 = vmatmul.mubr.msk.f32.gmra.mrb[6].mxu0 %vm97_vm0, %v932_v35  ;;  %v1521_v35 = vld [vmem:[%s1647_s2 + $0x38] sm:$0xff] }
 0x10e   :  { %v1423_v36 = vpop.f32.mrb[0].mxu0 }
 0x10f   :  { %v1425_v37 = vpop.f32.mrb[1].mxu0  ;;  %v255_v42 = vsel %vm251_vm3, %v1423_v36, 0.0 }
 0x110   :  { %1093 = vmatprep.mubr.msk.f32.mxu1 %vm251_vm3, %v1425_v37  ;;  %v252_v38 = vsel %vm251_vm3, %v1425_v37, 0.0 }
 0x111   :  { %253 = vadd.xlane.f32.xlu0 %v252_v38 }
 0x112   :  { %v1431_v39 = vpop.f32.mrb[2].mxu0 }
 0x113   :  { %v1433_v40 = vpop.f32.mrb[3].mxu0  ;;  %v261_v41 = vsel %vm251_vm3, %v1431_v39, 0.0 }
 0x114   :  { %262 = vadd.xlane.f32.xlu1 %v261_v41  ;;  %v258_v45 = vsel %vm251_vm3, %v1433_v40, 0.0 }
 0x115   :  { %256 = vadd.xlane.f32.xlu0 %v255_v42 }
 0x116   :  { %v1439_v43 = vpop.f32.mrb[4].mxu0 }
 0x117   :  { %v1441_v44 = vpop.f32.mrb[5].mxu0  ;;  %v267_v47 = vsel %vm251_vm3, %v1439_v43, 0.0 }
 0x118   :  { %259 = vadd.xlane.f32.xlu1 %v258_v45  ;;  %v264_v46 = vsel %vm251_vm3, %v1441_v44, 0.0 }
 0x119   :  { %265 = vadd.xlane.f32.xlu0 %v264_v46 }
 0x11a   :  { %v1449_v48 = vpop.f32.mrb[6].mxu0 }
 0x11b   :  { %v1451_v49 = vpop.f32.mrb[7].mxu0  ;;  %v273_v51 = vsel %vm251_vm3, %v1449_v48, 0.0 }
 0x11c   :  { %268 = vadd.xlane.f32.xlu1 %v267_v47  ;;  %v270_v50 = vsel %vm251_vm3, %v1451_v49, 0.0 }
 0x11d   :  { %271 = vadd.xlane.f32.xlu0 %v270_v50  ;;  %v628_v50 = vld [vmem:[%s1646_s1] sm:$0xff] }
 0x120   :  { %274 = vadd.xlane.f32.xlu1 %v273_v51  ;;  %v1339_v51 = vmov 1  }
 0x121   :  { %1279 = vset.pattern.permute.xlu1 %v1339_v51 }
 0x131   :  { %645 = vperm.xlu1 %1279, %v628_v50  }
 0x19e   :  { %v254_v52 = vpop.xlane.xlu0 %253 }
 0x19f   :  { %v284_v53 = vmax.f32 %v254_v52, 1e-12  ;;  %vm276_vm0 = vcmp.gt.f32.partialorder %v254_v52, 0.0  ;;  %v1340_v52 = vmov 0  }
 0x1a0   :  { %1278 = vset.pattern.permute.xlu0 %v1340_v52  ;;  %1280 = vset.pattern.permute.xlu1 %v1340_v52 }
 0x1a1   :  { %1283 = vrsqrt.f32 %v284_v53  ;;  %v263_v54 = vpop.xlane.xlu1 %262  ;;  %633 = vperm.xlu0 %1278, %v628_v50   ;;  %v629_v53 = vld [vmem:[%s1646_s1 + $0x8] sm:$0xff]  ;;  %s316_s1 = sld [smem:[#allocation2]] }
 0x1a2   :  { %v287_v55 = vmax.f32 %v263_v54, 1e-12  ;;  %v257_v56 = vpop.xlane.xlu0 %256  ;;  %vm279_vm5 = vcmp.gt.f32.partialorder %v263_v54, 0.0  ;;  %636 = vperm.xlu1 %1280, %v629_v53  }
 0x1a3   :  { %v285_v57 = vmax.f32 %v257_v56, 1e-12  ;;  %vm277_vm4 = vcmp.gt.f32.partialorder %v257_v56, 0.0 }
 0x1a4   :  { %1285 = vrsqrt.f32 %v287_v55 }
 0x1a5   :  { %1287 = vrsqrt.f32 %v285_v57  ;;  %v260_v58 = vpop.xlane.xlu1 %259  ;;  %1282 = vset.pattern.permute.xlu0 %v1339_v51 }
 0x1a6   :  { %v286_v59 = vmax.f32 %v260_v58, 1e-12  ;;  %v266_v60 = vpop.xlane.xlu0 %265  ;;  %vm278_vm6 = vcmp.gt.f32.partialorder %v260_v58, 0.0  ;;  %1281 = vset.pattern.permute.xlu1 %v1339_v51 }
 0x1a7   :  { %v288_v61 = vmax.f32 %v266_v60, 1e-12  ;;  %vm280_vm7 = vcmp.gt.f32.partialorder %v266_v60, 0.0  ;;  %648 = vperm.xlu1 %1281, %v629_v53  }
 0x1a8   :  { %1289 = vrsqrt.f32 %v286_v59 }
 0x1a9   :  { %1291 = vrsqrt.f32 %v288_v61  ;;  %v269_v62 = vpop.xlane.xlu1 %268 }
 0x1aa   :  { %v289_v63 = vmax.f32 %v269_v62, 1e-12  ;;  %v272_v1 = vpop.xlane.xlu0 %271  ;;  %vm281_vm8 = vcmp.gt.f32.partialorder %v269_v62, 0.0 }
 0x1ab   :  { %v1284_v2 = vpop.eup %1283  ;;  %v290_v3 = vmax.f32 %v272_v1, 1e-12  ;;  %vm282_vm9 = vcmp.gt.f32.partialorder %v272_v1, 0.0 }
 0x1ac   :  { %1293 = vrsqrt.f32 %v289_v63  ;;  %v1457_v6 = vsel %vm276_vm0, %v1284_v2, 0.0 }
 0x1ad   :  { %1295 = vrsqrt.f32 %v290_v3  ;;  %v275_v4 = vpop.xlane.xlu1 %274  ;;  %v326_v14 = vmul.f32 %v1462_v8, %v1457_v6 }
 0x1ae   :  { %v1286_v5 = vpop.eup %1285  ;;  %v291_v7 = vmax.f32 %v275_v4, 1e-12  ;;  %vm283_vm10 = vcmp.gt.f32.partialorder %v275_v4, 0.0 }
 0x1af   :  { %v1288_v10 = vpop.eup %1287  ;;  %v1471_v13 = vsel %vm279_vm5, %v1286_v5, 0.0 }
 0x1b0   :  { %v1469_v12 = vsel %vm277_vm4, %v1288_v10, 0.0  ;;  %1297 = vrsqrt.f32 %v291_v7  ;;  %v329_v23 = vmul.f32 %v1485_v17, %v1471_v13 }
 0x1b1   :  { %v327_v15 = vmul.f32 %v1467_v9, %v1469_v12 }
 0x1b2   :  { %v1290_v18 = vpop.eup %1289 }
 0x1b3   :  { %v1292_v19 = vpop.eup %1291  ;;  %v1487_v20 = vsel %vm278_vm6, %v1290_v18, 0.0  ;;  %v1202_v21 = vpack.c.bf16 %v327_v15, %v326_v14 }
 0x1b4   :  { %v328_v22 = vmul.f32 %v1480_v16, %v1487_v20  ;;  %v1493_v24 = vsel %vm280_vm7, %v1292_v19, 0.0 }
 0x1b5   :  { %1203 = vmatprep.subr.bf16.mxu1 %v1202_v21  ;;  %v330_v31 = vmul.f32 %v1498_v25, %v1493_v24 }
 0x1b6   :  { %v1294_v27 = vpop.eup %1293  ;;  %1205 = vmatpush3.bf16.msra.mxu1 %v1202_v21  ;;  %v1206_v28 = vpack.c.bf16 %v329_v23, %v328_v22 }
 0x1b7   :  { %v1296_v29 = vpop.eup %1295  ;;  %v1505_v30 = vsel %vm281_vm8, %v1294_v27, 0.0 }
 0x1b8   :  { %1207 = vmatprep.subr.bf16.mxu1 %v1206_v28  ;;  %v331_v32 = vmul.f32 %v1503_v26, %v1505_v30  ;;  %v1511_v33 = vsel %vm282_vm9, %v1296_v29, 0.0 }
 0x1b9   :  { %v332_v45 = vmul.f32 %v1516_v34, %v1511_v33 }
 0x1ba   :  { %v1298_v38 = vpop.eup %1297  ;;  %1209 = vmatpush3.bf16.msra.mxu1 %v1206_v28  ;;  %v1210_v41 = vpack.c.bf16 %v331_v32, %v330_v31  ;;  %v646_v31 = vpop.permute.xlu1 %645 }
 0x1bb   :  { %v1523_v42 = vsel %vm283_vm10, %v1298_v38, 0.0 }
 0x1bc   :  { %1211 = vmatprep.subr.bf16.mxu1 %v1210_v41  ;;  %v333_v46 = vmul.f32 %v1521_v35, %v1523_v42 }
 0x1be   :  { %1213 = vmatpush3.bf16.msra.mxu1 %v1210_v41  ;;  %v1214_v47 = vpack.c.bf16 %v333_v46, %v332_v45  ;;  %v611_v45 = vstv %s966_s14 }
 0x1c0   :  { %1215 = vmatprep.subr.bf16.mxu1 %v1214_v47 }
 0x1c2   :  { %1217 = vmatpush3.bf16.msra.mxu1 %v1214_v47 }
 0x1c5   :  { %1094 = vmatmul.mubr.msk.f32.vlgmr.msra.gmra.mrb[0].mxu1 %vm251_vm3, %v1423_v36 }
 0x1c6   :  { %1096 = vmatprep.mubr.msk.f32.mxu1 %vm251_vm3, %v1433_v40 }
 0x1c9   :  { %1097 = vmatmul.mubr.msk.f32.gmra.mrb[2].mxu1 %vm251_vm3, %v1431_v39 }
 0x1ca   :  { %1099 = vmatprep.mubr.msk.f32.mxu1 %vm251_vm3, %v1441_v44 }
 0x1cd   :  { %1100 = vmatmul.mubr.msk.f32.gmra.mrb[4].mxu1 %vm251_vm3, %v1439_v43 }
 0x1ce   :  { %1102 = vmatprep.mubr.msk.f32.mxu1 %vm251_vm3, %v1451_v49 }
 0x1d1   :  { %1103 = vmatmul.mubr.msk.f32.gmra.mrb[6].mxu1 %vm251_vm3, %v1449_v48 }
 0x1d2   :  { %1121 = vmatprep.mubr.msk.f32.mxu1 %vm251_vm3, %v1425_v37 }
 0x298   :  { %v1095_v37 = vpop.f32.mrb[0].mxu1 }
 0x299   :  { %v464_v54 = vmul.f32 %v1095_v37, %v1469_v12  ;;  %v424_v55 = vpop.f32.mrb[1].mxu1 }
 0x29a   :  { %v463_v56 = vmul.f32 %v424_v55, %v1457_v6 }
 0x29b   :  { %v490_v57 = vmul.f32 %v464_v54, %v1469_v12 }
 0x29c   :  { %v489_v58 = vmul.f32 %v463_v56, %v1457_v6  ;;  %v1098_v59 = vpop.f32.mrb[2].mxu1 }
 0x29d   :  { %v466_v60 = vmul.f32 %v1098_v59, %v1471_v13  ;;  %v434_v61 = vpop.f32.mrb[3].mxu1 }
 0x29e   :  { %v1557_v62 = vmul.f32 %v434_v61, %v1487_v20  ;;  %v1218_v63 = vpack.c.bf16 %v490_v57, %v489_v58 }
 0x29f   :  { %v492_v1 = vmul.f32 %v466_v60, %v1471_v13 }
 0x2a0   :  { %v491_v2 = vmul.f32 %v1557_v62, %v1487_v20  ;;  %v1101_v3 = vpop.f32.mrb[4].mxu1  ;;  %1219 = vmatprep.subr.bf16.mxu1 %v1218_v63 }
 0x2a1   :  { %v1563_v4 = vmul.f32 %v1101_v3, %v1505_v30  ;;  %v444_v5 = vpop.f32.mrb[5].mxu1  ;;  %1221 = vmatpush3.bf16.msra.mxu1 %v1218_v63 }
 0x2a2   :  { %v1566_v7 = vmul.f32 %v444_v5, %v1493_v24  ;;  %v1222_v10 = vpack.c.bf16 %v492_v1, %v491_v2 }
 0x2a3   :  { %v494_v14 = vmul.f32 %v1563_v4, %v1505_v30 }
 0x2a4   :  { %v493_v15 = vmul.f32 %v1566_v7, %v1493_v24  ;;  %v1104_v18 = vpop.f32.mrb[6].mxu1  ;;  %1223 = vmatprep.subr.bf16.mxu1 %v1222_v10 }
 0x2a5   :  { %v1573_v19 = vmul.f32 %v1104_v18, %v1523_v42  ;;  %v454_v21 = vpop.f32.mrb[7].mxu1  ;;  %1225 = vmatpush3.bf16.msra.mxu1 %v1222_v10 }
 0x2a6   :  { %v1576_v22 = vmul.f32 %v454_v21, %v1511_v33  ;;  %v1226_v23 = vpack.c.bf16 %v494_v14, %v493_v15  ;;  %v637_v21 = vpop.permute.xlu1 %636 }
 0x2a7   :  { %v496_v27 = vmul.f32 %v1573_v19, %v1523_v42 }
 0x2a8   :  { %v495_v28 = vmul.f32 %v1576_v22, %v1511_v33  ;;  %1227 = vmatprep.subr.bf16.mxu1 %v1226_v23 }
 0x2a9   :  { %1229 = vmatpush3.bf16.msra.mxu1 %v1226_v23 }
 0x2aa   :  { %v1230_v29 = vpack.c.bf16 %v496_v27, %v495_v28 }
 0x2ac   :  { %1231 = vmatprep.subr.bf16.mxu1 %v1230_v29 }
 0x2ad   :  { %1233 = vmatpush3.bf16.msra.mxu1 %v1230_v29 }
 0x2b0   :  { %1122 = vmatmul.mubr.msk.f32.vlgmr.msra.gmra.mrb[8].mxu1 %vm251_vm3, %v1423_v36  ;;  %v1597_v36 = vand.u32 127, %v32_v0  ;;  %v472_v0 = vstv %s957_s13 }
 0x2b1   :  { %1124 = vmatprep.mubr.msk.f32.mxu1 %vm251_vm3, %v1433_v40  ;;  %v634_v40 = vpop.permute.xlu0 %633  ;;  %v473_v38 = vmul.f32 %v472_v0, %v463_v56  ;;  %v476_v53 = vmul.f32 %v472_v0, %v466_v60  ;;  %v480_v18 = vmul.f32 %v472_v0, %v1573_v19 }
 0x2b2   :  { %vm650_vm11 = vcmp.eq.s32.totalorder %v1597_v36, %v646_v31  ;;  %vm638_vm12 = vcmp.eq.s32.totalorder %v1597_v36, %v634_v40  ;;  %vm639_vm14 = vcmp.eq.s32.totalorder %v1597_v36, %v637_v21 }
 0x2b4   :  { %1125 = vmatmul.mubr.msk.f32.gmra.mrb[10].mxu1 %vm251_vm3, %v1431_v39  ;;  %v969_v39 = vsel %vm650_vm11, 1.0, %v1338_v11 }
 0x2b5   :  { %1127 = vmatprep.mubr.msk.f32.mxu1 %vm251_vm3, %v1441_v44  ;;  %v317_v44 = vstv %s316_s1 }
 0x2b6   :  { %v318_v32 = vmul.f32 %v317_v44, %v1462_v8  ;;  %v321_v52 = vmul.f32 %v317_v44, %v1485_v17  ;;  %v320_v57 = vmul.f32 %v317_v44, %v1480_v16  ;;  %v478_v17 = vmul.f32 %v472_v0, %v1563_v4 }
 0x2b7   :  { %v322_v60 = vmul.f32 %v317_v44, %v1498_v25 }
 0x2b8   :  { %1128 = vmatmul.mubr.msk.f32.gmra.mrb[12].mxu1 %vm251_vm3, %v1439_v43  ;;  %v967_v43 = vsel %vm638_vm12, 1.0, %v1338_v11  ;;  %v481_v55 = vadd.f32 %v473_v38, %v318_v32  ;;  %v484_v63 = vadd.f32 %v476_v53, %v321_v52  ;;  %v968_v32 = vsel %vm639_vm14, 1.0, %v1338_v11 }
 0x2b9   :  { %1130 = vmatprep.mubr.msk.f32.mxu1 %vm251_vm3, %v1451_v49  ;;  %1149 = vmatprep.mubr.msk.f32.mxu0 %vm251_vm3, %v967_v43  ;;  %v474_v49 = vmul.f32 %v472_v0, %v464_v54  ;;  %v1341_v38 = vmov 0.0|0.0   ;;  %v1343_v52 = vmov 1.0  }
 0x2bc   :  { %1131 = vmatmul.mubr.msk.f32.gmra.mrb[14].mxu1 %vm251_vm3, %v1449_v48  ;;  %v319_v48 = vmul.f32 %v317_v44, %v1467_v9  ;;  %v475_v9 = vmul.f32 %v472_v0, %v1557_v62  ;;  %v477_v62 = vmul.f32 %v472_v0, %v1566_v7 }
 0x2bd   :  { %1168 = vmatprep.mubr.msk.f32.mxu1 %vm251_vm3, %v969_v39 }
 0x2be   :  { %v482_v51 = vadd.f32 %v474_v49, %v319_v48  ;;  %v483_v16 = vadd.f32 %v475_v9, %v320_v57  ;;  %v485_v23 = vadd.f32 %v477_v62, %v322_v60 }
 0x383   :  { %v1123_v41 = vpop.f32.mrb[8].mxu1 }
 0x384   :  { %v603_v46 = vmul.f32 %v1123_v41, %v1469_v12  ;;  %v563_v47 = vpop.f32.mrb[9].mxu1  ;;  %v323_v12 = vmul.f32 %v317_v44, %v1503_v26 }
 0x385   :  { %v602_v50 = vmul.f32 %v563_v47, %v1457_v6 }
 0x386   :  { %v613_v37 = vmul.f32 %v611_v45, %v603_v46  ;;  %v486_v25 = vadd.f32 %v478_v17, %v323_v12 }
 0x387   :  { %v612_v54 = vmul.f32 %v611_v45, %v602_v50  ;;  %v1126_v8 = vpop.f32.mrb[10].mxu1 }
 0x388   :  { %v621_v56 = vadd.f32 %v613_v37, %v482_v51  ;;  %v605_v58 = vmul.f32 %v1126_v8, %v1471_v13  ;;  %v573_v59 = vpop.f32.mrb[11].mxu1  ;;  %v325_v13 = vmul.f32 %v317_v44, %v1521_v35  ;;  %v479_v35 = vmul.f32 %v472_v0, %v1576_v22  ;;  %v649_v0 = vpop.permute.xlu1 %648 }
 0x389   :  { %v620_v61 = vadd.f32 %v612_v54, %v481_v55  ;;  %v604_v6 = vmul.f32 %v573_v59, %v1487_v20  ;;  %v324_v20 = vmul.f32 %v317_v44, %v1516_v34  ;;  %vm651_vm13 = vcmp.eq.s32.totalorder %v1597_v36, %v649_v0 }
 0x38a   :  { %v615_v1 = vmul.f32 %v611_v45, %v605_v58  ;;  %v488_v19 = vadd.f32 %v480_v18, %v325_v13 }
 0x38b   :  { %v1234_v2 = vpack.c.bf16 %v621_v56, %v620_v61  ;;  %v614_v3 = vmul.f32 %v611_v45, %v604_v6  ;;  %v1129_v5 = vpop.f32.mrb[12].mxu1  ;;  %v487_v43 = vadd.f32 %v479_v35, %v324_v20 }
 0x38c   :  { %v623_v10 = vadd.f32 %v615_v1, %v484_v63  ;;  %v607_v26 = vmul.f32 %v1129_v5, %v1505_v30  ;;  %v583_v14 = vpop.f32.mrb[13].mxu1 }
 0x38d   :  { %v622_v15 = vadd.f32 %v614_v3, %v483_v16  ;;  %v606_v4 = vmul.f32 %v583_v14, %v1493_v24  ;;  %1235 = vmatprep.subr.bf16.mxu0 %v1234_v2  ;;  %1251 = vmatprep.subr.bf16.mxu1 %v1234_v2 }
 0x38e   :  { %v617_v7 = vmul.f32 %v611_v45, %v607_v26  ;;  %1237 = vmatpush3.bf16.msra.mxu0 %v1234_v2  ;;  %1253 = vmatpush3.bf16.msra.mxu1 %v1234_v2 }
 0x38f   :  { %v1238_v27 = vpack.c.bf16 %v623_v10, %v622_v15  ;;  %v616_v30 = vmul.f32 %v611_v45, %v606_v4  ;;  %v1132_v28 = vpop.f32.mrb[14].mxu1 }
 0x390   :  { %v625_v29 = vadd.f32 %v617_v7, %v486_v25  ;;  %v609_v34 = vmul.f32 %v1132_v28, %v1523_v42  ;;  %v593_v31 = vpop.f32.mrb[15].mxu1 }
 0x391   :  { %v624_v24 = vadd.f32 %v616_v30, %v485_v23  ;;  %v608_v39 = vmul.f32 %v593_v31, %v1511_v33  ;;  %1239 = vmatprep.subr.bf16.mxu0 %v1238_v27  ;;  %1255 = vmatprep.subr.bf16.mxu1 %v1238_v27  ;;  %v970_v33 = vsel %vm651_vm13, 1.0, %v1338_v11 }
 0x392   :  { %v619_v40 = vmul.f32 %v611_v45, %v609_v34  ;;  %1241 = vmatpush3.bf16.msra.mxu0 %v1238_v27  ;;  %1257 = vmatpush3.bf16.msra.mxu1 %v1238_v27 }
 0x393   :  { %v1242_v44 = vpack.c.bf16 %v625_v29, %v624_v24  ;;  %v618_v48 = vmul.f32 %v611_v45, %v608_v39 }
 0x394   :  { %v627_v22 = vadd.f32 %v619_v40, %v488_v19 }
 0x395   :  { %v626_v49 = vadd.f32 %v618_v48, %v487_v43  ;;  %1243 = vmatprep.subr.bf16.mxu0 %v1242_v44  ;;  %1259 = vmatprep.subr.bf16.mxu1 %v1242_v44 }
 0x396   :  { %1245 = vmatpush3.bf16.msra.mxu0 %v1242_v44  ;;  %1261 = vmatpush3.bf16.msra.mxu1 %v1242_v44 }
 0x397   :  { %v1246_v42 = vpack.c.bf16 %v627_v22, %v626_v49 }
 0x399   :  { %1247 = vmatprep.subr.bf16.mxu0 %v1246_v42  ;;  %1263 = vmatprep.subr.bf16.mxu1 %v1246_v42 }
 0x39a   :  { %1249 = vmatpush3.bf16.msra.mxu0 %v1246_v42  ;;  %1265 = vmatpush3.bf16.msra.mxu1 %v1246_v42 }
 0x39b   :  { %1266 = vmatprep.subr.bf16.mxu0 %v1341_v38 }
 0x39d   :  { %1150 = vmatmul.mubr.msk.f32.vlgmr.msra.gmra.mrb[8].mxu0 %vm251_vm3, %v968_v32  ;;  %1169 = vmatmul.mubr.msk.f32.vlgmr.msra.gmra.mrb[16].mxu1 %vm251_vm3, %v970_v33  ;;  %vm900_vm3 = vcmask 122880  }
 0x39e   :  { %1175 = vmatprep.mubr.msk.f32.mxu0 %vm1342_vm15, %v1338_v11 }
 0x470   :  { %v1151_v41 = vpop.f32.mrb[8].mxu0  ;;  %v1170_v45 = vpop.f32.mrb[16].mxu1 }
 0x471   :  { %v819_v36 = vmul.f32 %v1170_v45, %v1151_v41  ;;  %v728_v46 = vpop.f32.mrb[9].mxu0  ;;  %v809_v47 = vpop.f32.mrb[17].mxu1 }
 0x472   :  { %v818_v50 = vmul.f32 %v809_v47, %v728_v46 }
 0x474   :  { %v1267_v51 = vpack.c.bf16 %v819_v36, %v818_v50 }
 0x476   :  { %1269 = vmatpush3.bf16.xpose.msk.msra.mxu0 %vm1268_vm2, %v1267_v51 }
 0x47d   :  { %1176 = vmatmul.mubr.msk.f32.vlgmr.msra.gmra.mrb[10].mxu0 %vm820_vm1, %v1343_v52 }
 0x550   :  { %v896_v53 = vpop.f32.mrb[10].mxu0 }
 0x551   :  { %v1177_v37 = vpop.f32.mrb[11].mxu0  ;;  %901 = vst.msk [vmem:[#allocation5] sm:$0x1] %vm900_vm3, %v896_v53 }
 0x552   :  { %1322 = shalt.err (!%p1319_p9)
}
 0x553   :  { %s1323_s21 = scalar_lea.hbm %s1649_s4, 16 }
 0x554   :  { %p1324_p10 = scmp.ne.s32.totalorder %s1649_s4, %s1323_s21  ;;  %p1327_p11 = scmp.lt.u32.totalorder %s1323_s21, %s1649_s4 }
 0x556   :  { %p1329_p12 = pnand %p1327_p11, %p1324_p10 }
 0x558   :  { %1332 = shalt.err (!%p1329_p12)
}
 0x559   :  { %911 = dma.vmem_to_hbm [thread:$0]  %s909_s16, 16, %s1649_s4, [#allocation3]  }
 0x55a   :  { %1335 = dma.done.wait [#allocation3], 16  }
 0x55b   :  { %1336 = vsyncadd [#allocation3], 4294967280 }
 0x55c   :  { %915 = vsyncpa [#allocation3], 1 }
 0x55d   :  { %916 = vsyncpa [#allocation4], 1 }

</bundles_post_ra>
